<compile_context>
chip_gen: v7x
topology: tpu7x:2x2x1
jax: 0.10.0
libtpu: 0.0.40
codegen_flags: <defaults>
</compile_context>

<pallas_src>
import functools

import jax
import jax.numpy as jnp
import numpy as np
from jax.experimental import pallas as pl
from jax.experimental.pallas import tpu as pltpu


def _round_up(n, m):
    return ((n + m - 1) // m) * m


def _cdiv(a, b):
    return (a + b - 1) // b


# ----------------------------- Pallas kernel ------------------------------ #
def expert_kernel(x_ref, wc_ref, bc_ref, w1_ref, b1_ref, w2_ref, b2_ref,
                  out_ref):
    # x_ref : (TBp, P*W*M)   batch tile, P samples packed per row, f32
    # wc_ref: (P*W*M, P*K*M) block-diagonal expanded conv weight (bf16/f32)
    # bc_ref: (1, P*K*M)     conv bias in flatten order, tiled over P (f32)
    # w1_ref: (P*K*M, P*H)   block-diagonal fc1 weight (transposed)
    # b1_ref: (1, P*H)       fc1 bias tiled over P (f32)
    # w2_ref: (P*H, P*O)     block-diagonal fc2 weight (transposed)
    # b2_ref: (1, P*O)       fc2 bias tiled over P (f32)
    # out_ref: (TBp, P*O)

    # In-kernel cast of x to the MXU operand dtype (free on VPU slack);
    # x is shipped from HBM as f32 so there is no separate XLA convert pass.
    x = x_ref[...].astype(wc_ref.dtype)

    # Conv as one dense 2-D MXU matmul; output columns are already in
    # PyTorch flatten order (k*M + m, per packed sample) thanks to the
    # block-diagonal weight.
    h = jnp.dot(x, wc_ref[...], preferred_element_type=jnp.float32)
    h = jnp.maximum(h + bc_ref[...], 0.0)                     # conv bias + ReLU

    # TODO(synk): nn.Dropout is identity at inference; no stochastic mask.

    y1 = jnp.dot(h.astype(w1_ref.dtype), w1_ref[...],
                 preferred_element_type=jnp.float32)
    y1 = jnp.maximum(y1 + b1_ref[...], 0.0)                   # fc1 + ReLU

    out_ref[...] = (jnp.dot(y1.astype(w2_ref.dtype), w2_ref[...],
                            preferred_element_type=jnp.float32)
                    + b2_ref[...])                            # fc2


# ------------------- one-time weight preprocessing ------------------------- #
def prepare_expert_params(conv_w, conv_b, fc1_w, fc1_b, fc2_w, fc2_b,
                          *, pack_p=4, param_dtype=jnp.bfloat16):
    """Hoisted off the serving path: build P-way batch-packed weights.

    PyTorch layouts in: conv_w (K,1,W,1), conv_b (K,), fc1_w (H, K*M),
    fc1_b (H,), fc2_w (O, H), fc2_b (O,).

    pack_p: how many batch samples share one kernel row (4 suits the
    256-wide MXU of v6e/v7x; 2 is enough for v5e's 128-wide MXU — both are
    correct on all generations).  param_dtype=bfloat16 is the production
    setting (MXU-native); f32 is kept for testing.
    """
    K = conv_w.shape[0]
    W = conv_w.shape[2]
    H, KM = fc1_w.shape
    O = fc2_w.shape[0]
    M = KM // K
    P = int(pack_p)

    wc = conv_w[:, 0, :, 0].astype(jnp.float32)                # (K, W)
    eye_m = jnp.eye(M, dtype=jnp.float32)
    # wc_exp[w*M + m, k*M + m] = wc[k, w]; zero elsewhere (flatten order k*M+m)
    wc_exp = jnp.einsum('kw,mn->wmkn', wc, eye_m).reshape(W * M, K * M)
    w1t = fc1_w.T.astype(jnp.float32)                          # (K*M, H)
    w2t = fc2_w.T.astype(jnp.float32)                          # (H, O)

    eye_p = jnp.eye(P, dtype=jnp.float32)

    def block_diag(a):
        r, c = a.shape
        return jnp.einsum('pq,ab->paqb', eye_p, a).reshape(P * r, P * c)

    return {
        "wc": block_diag(wc_exp).astype(param_dtype),          # (P*W*M, P*K*M)
        "bc": jnp.tile(jnp.repeat(conv_b, M), P)
                 .reshape(1, P * K * M).astype(jnp.float32),
        "w1": block_diag(w1t).astype(param_dtype),             # (P*K*M, P*H)
        "b1": jnp.tile(fc1_b, P).reshape(1, P * H).astype(jnp.float32),
        "w2": block_diag(w2t).astype(param_dtype),             # (P*H, P*O)
        "b2": jnp.tile(fc2_b, P).reshape(1, P * O).astype(jnp.float32),
    }


# ------------------------------ JAX wrapper -------------------------------- #
@functools.partial(jax.jit, static_argnames=("block_b",))
def expert_forward(x, params, *, block_b=2048):
    """x: (B, window, n_multiv) f32; params from prepare_expert_params."""
    B, W, M = x.shape
    WM = W * M
    PWM, PKM = params["wc"].shape
    PH = params["w1"].shape[1]
    PO = params["w2"].shape[1]
    P = PWM // WM
    O = PO // P

    # ---- batch packing & tiling over packed rows --------------------------- #
    Bp = _cdiv(B, P)                                 # packed rows needed
    desired = max(8, _round_up(max(block_b, P) // P, 8))
    steps = max(1, _cdiv(Bp, desired))
    if steps == 1 and Bp > 8:
        steps = 2            # >=2 grid steps so v7x's second TensorCore works
    TBp = _round_up(_cdiv(Bp, steps), 8)             # packed-row tile (mult of 8)
    Bp_pad = TBp * steps
    B_pad = Bp_pad * P

    x2 = x.reshape(B, WM)                            # free row-major view, f32
    if B_pad != B:
        # TODO(synk): only the ragged tail strictly needs padding; the full
        # pad is kept for simplicity (no copy when B is already tile-aligned,
        # and padding is bounded by ~8*steps packed rows).
        x2 = jnp.pad(x2, ((0, B_pad - B), (0, 0)))
    xp = x2.reshape(Bp_pad, P * WM)                  # row r = samples rP..rP+P-1

    out = pl.pallas_call(
        expert_kernel,
        out_shape=jax.ShapeDtypeStruct((Bp_pad, PO), jnp.float32),
        grid_spec=pltpu.PrefetchScalarGridSpec(
            num_scalar_prefetch=0,
            grid=(steps,),
            in_specs=[
                # x batch tile: pipelined / double-buffered over the grid.
                pl.BlockSpec((TBp, P * WM), lambda i: (i, 0)),
                # Weights & biases: constant block index -> VMEM resident.
                pl.BlockSpec((PWM, PKM), lambda i: (0, 0)),
                pl.BlockSpec((1, PKM), lambda i: (0, 0)),
                pl.BlockSpec((PKM, PH), lambda i: (0, 0)),
                pl.BlockSpec((1, PH), lambda i: (0, 0)),
                pl.BlockSpec((PH, PO), lambda i: (0, 0)),
                pl.BlockSpec((1, PO), lambda i: (0, 0)),
            ],
            out_specs=pl.BlockSpec((TBp, PO), lambda i: (i, 0)),
        ),
        compiler_params=pltpu.CompilerParams(
            dimension_semantics=("parallel",),   # shard batch tiles across TCs
        ),
    )(xp, params["wc"], params["bc"], params["w1"], params["b1"],
      params["w2"], params["b2"])

    # Unpack: row r, cols p*O:(p+1)*O hold sample r*P+p -> free row-major reshape.
    return out.reshape(B_pad, O)[:B]


# ----------------------------- pure-JAX reference -------------------------- #
def expert_ref(x, conv_w, conv_b, fc1_w, fc1_b, fc2_w, fc2_b):
    wc = conv_w[:, 0, :, 0]                                    # (K, W)
    h = jnp.einsum('bwm,kw->bkm', x, wc) + conv_b[None, :, None]
    h = jnp.maximum(h, 0.0)
    flat = h.reshape(x.shape[0], -1)                           # k*M + m order
    y1 = jnp.maximum(flat @ fc1_w.T + fc1_b, 0.0)
    return y1 @ fc2_w.T + fc2_b


# ---------------------------------- main ----------------------------------- #
if __name__ == "__main__":
    # Small config consistent with Expert(n_kernel, window, n_multiv, hidden,
    # output, drop_out).
    B, window, n_multiv = 2, 8, 4
    n_kernel, hidden_size, output_size = 16, 32, 8

    key = jax.random.PRNGKey(0)
    kx, k1, k2, k3, k4, k5, k6, k7 = jax.random.split(key, 8)

    x = jax.random.normal(kx, (B, window, n_multiv), dtype=jnp.float32)

    # Deterministic synthetic parameters (PyTorch layouts).
    conv_w = 0.1 * jax.random.normal(k1, (n_kernel, 1, window, 1), jnp.float32)
    conv_b = 0.1 * jax.random.normal(k2, (n_kernel,), jnp.float32)
    fc1_w = 0.1 * jax.random.normal(
        k3, (hidden_size, n_kernel * n_multiv), jnp.float32)
    fc1_b = 0.1 * jax.random.normal(k4, (hidden_size,), jnp.float32)
    fc2_w = 0.1 * jax.random.normal(k5, (output_size, hidden_size), jnp.float32)
    fc2_b = 0.1 * jax.random.normal(k6, (output_size,), jnp.float32)

    ref = expert_ref(x, conv_w, conv_b, fc1_w, fc1_b, fc2_w, fc2_b)

    # 1) Production path: pack P=4, bf16 MXU operands, f32 accumulation.
    params_bf16 = prepare_expert_params(conv_w, conv_b, fc1_w, fc1_b,
                                        fc2_w, fc2_b,
                                        pack_p=4, param_dtype=jnp.bfloat16)
    out_bf16 = jax.block_until_ready(expert_forward(x, params_bf16))
    np.testing.assert_allclose(np.asarray(out_bf16), np.asarray(ref),
                               rtol=2e-2, atol=2e-2)

    # 2) Full f32 path (test-only) — tight tolerance against the reference.
    params_f32 = prepare_expert_params(conv_w, conv_b, fc1_w, fc1_b,
                                       fc2_w, fc2_b,
                                       pack_p=4, param_dtype=jnp.float32)
    out_f32 = jax.block_until_ready(expert_forward(x, params_f32))
    np.testing.assert_allclose(np.asarray(out_f32), np.asarray(ref),
                               rtol=1e-5, atol=1e-5)

    # 3) Multi-step grid, ragged batch (B not a multiple of pack/tile), P=2.
    B2 = 100
    x_big = jax.random.normal(k7, (B2, window, n_multiv), dtype=jnp.float32)
    ref_big = expert_ref(x_big, conv_w, conv_b, fc1_w, fc1_b, fc2_w, fc2_b)
    params_p2 = prepare_expert_params(conv_w, conv_b, fc1_w, fc1_b,
                                      fc2_w, fc2_b,
                                      pack_p=2, param_dtype=jnp.float32)
    out_big = jax.block_until_ready(
        expert_forward(x_big, params_p2, block_b=16))
    np.testing.assert_allclose(np.asarray(out_big), np.asarray(ref_big),
                               rtol=1e-5, atol=1e-5)

    print("KERNEL_OK")
</pallas_src>

<mosaic_0001>
module attributes {stable_mosaic.version = 11 : i64} {
  func.func @expert_kernel(%arg0: i32, %arg1: memref<8x128xf32, #tpu.memory_space<vmem>>, %arg2: memref<128x256xbf16, #tpu.memory_space<vmem>>, %arg3: memref<1x256xf32, #tpu.memory_space<vmem>>, %arg4: memref<256x128xbf16, #tpu.memory_space<vmem>>, %arg5: memref<1x128xf32, #tpu.memory_space<vmem>>, %arg6: memref<128x32xbf16, #tpu.memory_space<vmem>>, %arg7: memref<1x32xf32, #tpu.memory_space<vmem>>, %arg8: memref<8x32xf32, #tpu.memory_space<vmem>>) attributes {dimension_semantics = [#tpu.dimension_semantics<parallel>], iteration_bounds = array<i64: 1>, scalar_prefetch = 0 : i64, scratch_operands = 0 : i64, tpu.core_type = #tpu.core_type<tc>, window_params = [{transform_indices = @transform_0, window_bounds = array<i64: 8, 128>}, {pipeline_mode = #tpu.pipeline_mode<synchronous>, transform_indices = @transform_1, window_bounds = array<i64: 128, 256>}, {pipeline_mode = #tpu.pipeline_mode<synchronous>, transform_indices = @transform_2, window_bounds = array<i64: 1, 256>}, {pipeline_mode = #tpu.pipeline_mode<synchronous>, transform_indices = @transform_3, window_bounds = array<i64: 256, 128>}, {pipeline_mode = #tpu.pipeline_mode<synchronous>, transform_indices = @transform_4, window_bounds = array<i64: 1, 128>}, {pipeline_mode = #tpu.pipeline_mode<synchronous>, transform_indices = @transform_5, window_bounds = array<i64: 128, 32>}, {pipeline_mode = #tpu.pipeline_mode<synchronous>, transform_indices = @transform_6, window_bounds = array<i64: 1, 32>}, {transform_indices = @transform_7, window_bounds = array<i64: 8, 32>}]} {
    %c0 = arith.constant 0 : index
    %c0_0 = arith.constant 0 : index
    %0 = vector.load %arg1[%c0, %c0_0] : memref<8x128xf32, #tpu.memory_space<vmem>>, vector<8x128xf32>
    %1 = arith.truncf %0 : vector<8x128xf32> to vector<8x128xbf16>
    %c0_1 = arith.constant 0 : index
    %c0_2 = arith.constant 0 : index
    %2 = vector.load %arg2[%c0_1, %c0_2] : memref<128x256xbf16, #tpu.memory_space<vmem>>, vector<128x256xbf16>
    %cst = arith.constant dense<0.000000e+00> : vector<8x256xf32>
    %3 = tpu.matmul %1, %2, %cst {dimension_numbers = #tpu.dot_dimension_numbers<[1], [0], [0], [1], [0, 0, 1, 1], [], []>} : vector<8x128xbf16>, vector<128x256xbf16>, vector<8x256xf32> -> vector<8x256xf32>
    %c0_3 = arith.constant 0 : index
    %c0_4 = arith.constant 0 : index
    %4 = vector.load %arg3[%c0_3, %c0_4] : memref<1x256xf32, #tpu.memory_space<vmem>>, vector<1x256xf32>
    %5 = vector.broadcast %4 : vector<1x256xf32> to vector<8x256xf32>
    %6 = arith.addf %3, %5 : vector<8x256xf32>
    %cst_5 = arith.constant 0.000000e+00 : f32
    %7 = vector.broadcast %cst_5 : f32 to vector<8x256xf32>
    %8 = arith.maximumf %6, %7 : vector<8x256xf32>
    %9 = arith.truncf %8 : vector<8x256xf32> to vector<8x256xbf16>
    %c0_6 = arith.constant 0 : index
    %c0_7 = arith.constant 0 : index
    %10 = vector.load %arg4[%c0_6, %c0_7] : memref<256x128xbf16, #tpu.memory_space<vmem>>, vector<256x128xbf16>
    %cst_8 = arith.constant dense<0.000000e+00> : vector<8x128xf32>
    %11 = tpu.matmul %9, %10, %cst_8 {dimension_numbers = #tpu.dot_dimension_numbers<[1], [0], [0], [1], [0, 0, 1, 1], [], []>} : vector<8x256xbf16>, vector<256x128xbf16>, vector<8x128xf32> -> vector<8x128xf32>
    %c0_9 = arith.constant 0 : index
    %c0_10 = arith.constant 0 : index
    %12 = vector.load %arg5[%c0_9, %c0_10] : memref<1x128xf32, #tpu.memory_space<vmem>>, vector<1x128xf32>
    %13 = vector.broadcast %12 : vector<1x128xf32> to vector<8x128xf32>
    %14 = arith.addf %11, %13 : vector<8x128xf32>
    %cst_11 = arith.constant 0.000000e+00 : f32
    %15 = vector.broadcast %cst_11 : f32 to vector<8x128xf32>
    %16 = arith.maximumf %14, %15 : vector<8x128xf32>
    %17 = arith.truncf %16 : vector<8x128xf32> to vector<8x128xbf16>
    %c0_12 = arith.constant 0 : index
    %c0_13 = arith.constant 0 : index
    %18 = vector.load %arg6[%c0_12, %c0_13] : memref<128x32xbf16, #tpu.memory_space<vmem>>, vector<128x32xbf16>
    %cst_14 = arith.constant dense<0.000000e+00> : vector<8x32xf32>
    %19 = tpu.matmul %17, %18, %cst_14 {dimension_numbers = #tpu.dot_dimension_numbers<[1], [0], [0], [1], [0, 0, 1, 1], [], []>} : vector<8x128xbf16>, vector<128x32xbf16>, vector<8x32xf32> -> vector<8x32xf32>
    %c0_15 = arith.constant 0 : index
    %c0_16 = arith.constant 0 : index
    %20 = vector.load %arg7[%c0_15, %c0_16] : memref<1x32xf32, #tpu.memory_space<vmem>>, vector<1x32xf32>
    %21 = vector.broadcast %20 : vector<1x32xf32> to vector<8x32xf32>
    %22 = arith.addf %19, %21 : vector<8x32xf32>
    %c0_17 = arith.constant 0 : index
    %c0_18 = arith.constant 0 : index
    %23 = vector.load %arg8[%c0_17, %c0_18] : memref<8x32xf32, #tpu.memory_space<vmem>>, vector<8x32xf32>
    tpu.vector_store %arg8[%c0_17, %c0_18], %22 {strides = array<i32>} : memref<8x32xf32, #tpu.memory_space<vmem>>, vector<8x32xf32>,
    return
  }
  func.func @transform_0(%arg0: i32) -> (i32, i32) {
    %c0_i32 = arith.constant 0 : i32
    %c0_i32_0 = arith.constant 0 : i32
    return %arg0, %c0_i32 : i32, i32
  }
  func.func @transform_1(%arg0: i32) -> (i32, i32) {
    %c0_i32 = arith.constant 0 : i32
    %c0_i32_0 = arith.constant 0 : i32
    %c0_i32_1 = arith.constant 0 : i32
    return %c0_i32, %c0_i32_0 : i32, i32
  }
  func.func @transform_2(%arg0: i32) -> (i32, i32) {
    %c0_i32 = arith.constant 0 : i32
    %c0_i32_0 = arith.constant 0 : i32
    %c0_i32_1 = arith.constant 0 : i32
    return %c0_i32, %c0_i32_0 : i32, i32
  }
  func.func @transform_3(%arg0: i32) -> (i32, i32) {
    %c0_i32 = arith.constant 0 : i32
    %c0_i32_0 = arith.constant 0 : i32
    %c0_i32_1 = arith.constant 0 : i32
    return %c0_i32, %c0_i32_0 : i32, i32
  }
  func.func @transform_4(%arg0: i32) -> (i32, i32) {
    %c0_i32 = arith.constant 0 : i32
    %c0_i32_0 = arith.constant 0 : i32
    %c0_i32_1 = arith.constant 0 : i32
    return %c0_i32, %c0_i32_0 : i32, i32
  }
  func.func @transform_5(%arg0: i32) -> (i32, i32) {
    %c0_i32 = arith.constant 0 : i32
    %c0_i32_0 = arith.constant 0 : i32
    %c0_i32_1 = arith.constant 0 : i32
    return %c0_i32, %c0_i32_0 : i32, i32
  }
  func.func @transform_6(%arg0: i32) -> (i32, i32) {
    %c0_i32 = arith.constant 0 : i32
    %c0_i32_0 = arith.constant 0 : i32
    %c0_i32_1 = arith.constant 0 : i32
    return %c0_i32, %c0_i32_0 : i32, i32
  }
  func.func @transform_7(%arg0: i32) -> (i32, i32) {
    %c0_i32 = arith.constant 0 : i32
    %c0_i32_0 = arith.constant 0 : i32
    return %arg0, %c0_i32 : i32, i32
  }
}

</mosaic_0001>

<bundles_post_ra>
// kernel: expert_forward.1
= control target key start
LH: loop header
LB: loop body
LE: loop exit
PB: predicated region body
PF: predicated region fallthrough
CT: control target
= control target key end

     0   :  { %12 = vsyncpa [#allocation3], 0  ;;  %s662_s24 = smov [#allocation2]   ;;  %s807_s0 = inlined_call_operand.vmem [shape: f32[8,128], index: 0, kind: input, shape index: {}]   ;;  %s808_s1 = inlined_call_operand.vmem [shape: bf16[128,256], index: 1, kind: input, shape index: {}]   ;;  %s809_s2 = inlined_call_operand.vmem [shape: f32[1,256], index: 2, kind: input, shape index: {}]   ;;  %s810_s3 = inlined_call_operand.hbm [shape: bf16[256,128], index: 3, kind: input, shape index: {}]   ;;  %s811_s4 = inlined_call_operand.vmem [shape: f32[1,128], index: 4, kind: input, shape index: {}]   ;;  %s812_s5 = inlined_call_operand.vmem [shape: bf16[128,32], index: 5, kind: input, shape index: {}]   ;;  %s813_s6 = inlined_call_operand.vmem [shape: f32[1,32], index: 6, kind: input, shape index: {}]   ;;  %s814_s7 = inlined_call_operand.vmem [shape: f32[8,32], index: 7, kind: output, shape index: {}]  }
   0x1   :  { %s24_s25 = sshll.u32 %s662_s24, 4  ;;  %s638_s28 = scalar_lea.hbm %s810_s3, 2048  ;;  %s25_s25 = int_to_ptr.vmem [resolvable:$true] %s24_s25 }
   0x2   :  { %p639_p0 = scmp.ne.s32.totalorder %s810_s3, %s638_s28  ;;  %p642_p1 = scmp.lt.u32.totalorder %s638_s28, %s810_s3 }
   0x4   :  { %p644_p2 = pnand %p642_p1, %p639_p0 }
   0x6   :  { %647 = shalt.err (!%p644_p2)
}
   0x7   :  { %s648_s10 = scalar_lea.vmem %s25_s25, 2048  ;;  %p653_p4 = scmp.lt.s32.totalorder %s25_s25, %s25_s25 }
   0x8   :  { %p649_p3 = scmp.ne.s32.totalorder %s25_s25, %s648_s10  ;;  %p654_p5 = scmp.lt.s32.totalorder %s648_s10, %s648_s10 }
   0xa   :  { %p655_p6 = por %p654_p5, %p653_p4 }
   0xc   :  { %p656_p7 = pnand %p655_p6, %p649_p3 }
   0xe   :  { %659 = shalt.err (!%p656_p7)
}
   0xf   :  { %s663_s11 = smov 64   ;;  %s664_s12 = smov 4  }
  0x10   :  { %30 = dma.hbm_to_vmem [thread:$0]  %s810_s3, 2048, %s25_s25, [#allocation3], %s663_s11, %s663_s11, %s664_s12  }
  0x11   :  { %660 = dma.done.wait [#allocation3], 2048  }
  0x12   :  { %661 = vsyncadd [#allocation3], 4294965248  ;;  %v665_v0 = vmov 0   ;;  %v590_v1 = vld [vmem:[%s808_s1 + $0x4] ss:$8 sps:$4 sm:$0xff]   ;;  %v618_v15 = vld [vmem:[#allocation2 + $0x50] sm:$0xff]   ;;  %v61_v42 = vlaneseq }
  0x13   :  { %183 = vmatprep.mubr.bf16.mxu0 %v665_v0  ;;  %v592_v2 = vld [vmem:[%s808_s1] ss:$8 sps:$4 sm:$0xff]   ;;  %151 = vmatprep.subr.bf16.mxu0 %v590_v1  ;;  %v593_v3 = vld [vmem:[%s808_s1 + $0x14] ss:$8 sps:$4 sm:$0xff]   ;;  %v595_v4 = vld [vmem:[%s808_s1 + $0x10] ss:$8 sps:$4 sm:$0xff]  }
  0x14   :  { %152 = vmatpush1.bf16.msra.mxu0 %v592_v2  ;;  %v596_v5 = vld [vmem:[%s808_s1 + $0x24] ss:$8 sps:$4 sm:$0xff]   ;;  %v598_v6 = vld [vmem:[%s808_s1 + $0x20] ss:$8 sps:$4 sm:$0xff]   ;;  %v599_v7 = vld [vmem:[%s808_s1 + $0x34] ss:$8 sps:$4 sm:$0xff]  }
  0x15   :  { %153 = vmatprep.subr.bf16.mxu0 %v593_v3  ;;  %v601_v8 = vld [vmem:[%s808_s1 + $0x30] ss:$8 sps:$4 sm:$0xff]   ;;  %v602_v9 = vld [vmem:[%s808_s1 + $0x44] ss:$8 sps:$4 sm:$0xff]   ;;  %v604_v12 = vld [vmem:[%s808_s1 + $0x40] ss:$8 sps:$4 sm:$0xff]  }
  0x16   :  { %v614_v10 = vld [vmem:[#allocation2 + $0x40] sm:$0xff]   ;;  %v616_v13 = vld [vmem:[#allocation2 + $0x48] sm:$0xff]   ;;  %v605_v16 = vld [vmem:[%s808_s1 + $0x54] ss:$8 sps:$4 sm:$0xff]   ;;  %v666_v36 = vmov 0.0   ;;  %v62_v43 = vshrl.u32 %v61_v42, 7 }
  0x17   :  { %v615_v11 = vld [vmem:[#allocation2] sm:$0xff]   ;;  %533 = vmatprep.subr.bf16.mxu1 %v614_v10  ;;  %v617_v14 = vld [vmem:[#allocation2 + $0x8] sm:$0xff]   ;;  %v607_v17 = vld [vmem:[%s808_s1 + $0x50] ss:$8 sps:$4 sm:$0xff]   ;;  %vm667_vm0 = vmmov 0   ;;  %vm484_vm1 = vcmask 261120  }
  0x18   :  { %154 = vmatpush1.bf16.msra.mxu0 %v595_v4  ;;  %534 = vmatpush3.bf16.msra.mxu1 %v615_v11  ;;  %v619_v18 = vld [vmem:[#allocation2 + $0x10] sm:$0xff]   ;;  %v620_v19 = vld [vmem:[#allocation2 + $0x58] sm:$0xff]   ;;  %v608_v20 = vld [vmem:[%s808_s1 + $0x64] ss:$8 sps:$4 sm:$0xff]   ;;  %v63_v44 = vsub.s32 0, %v62_v43  ;;  %v67_v46 = vsub.s32 1, %v62_v43 }
  0x19   :  { %155 = vmatprep.subr.bf16.mxu0 %v596_v5  ;;  %535 = vmatprep.subr.bf16.mxu1 %v616_v13  ;;  %v610_v21 = vld [vmem:[%s808_s1 + $0x60] ss:$8 sps:$4 sm:$0xff]   ;;  %v611_v22 = vld [vmem:[%s808_s1 + $0x74] ss:$8 sps:$4 sm:$0xff]   ;;  %v613_v26 = vld [vmem:[%s808_s1 + $0x70] ss:$8 sps:$4 sm:$0xff]  }
  0x1a   :  { %v621_v23 = vld [vmem:[#allocation2 + $0x18] sm:$0xff]   ;;  %v622_v24 = vld [vmem:[#allocation2 + $0x60] sm:$0xff]   ;;  %v624_v28 = vld [vmem:[#allocation2 + $0x68] sm:$0xff]  }
  0x1b   :  { %v623_v25 = vld [vmem:[#allocation2 + $0x20] sm:$0xff]   ;;  %v625_v29 = vld [vmem:[#allocation2 + $0x28] sm:$0xff]   ;;  %v626_v31 = vld [vmem:[#allocation2 + $0x70] sm:$0xff]  }
  0x1c   :  { %156 = vmatpush1.bf16.msra.mxu0 %v598_v6  ;;  %536 = vmatpush3.bf16.msra.mxu1 %v617_v14  ;;  %v41_v27 = vld [vmem:[%s807_s0] sm:$0xff]  ;;  %v627_v32 = vld [vmem:[#allocation2 + $0x30] sm:$0xff]   ;;  %v628_v33 = vld [vmem:[#allocation2 + $0x78] sm:$0xff]  }
  0x1d   :  { %157 = vmatprep.subr.bf16.mxu0 %v599_v7  ;;  %537 = vmatprep.subr.bf16.mxu1 %v618_v15  ;;  %v42_v30 = vpack.c.bf16 %v41_v27, %v41_v27  ;;  %v629_v34 = vld [vmem:[#allocation2 + $0x38] sm:$0xff]   ;;  %v630_v35 = vld [vmem:[%s812_s5] sm:$0xff]   ;;  %v631_v37 = vld [vmem:[%s812_s5 + $0x8] sm:$0xff]  }
  0x1e   :  { %v632_v38 = vld [vmem:[%s812_s5 + $0x10] sm:$0xff]   ;;  %v633_v39 = vld [vmem:[%s812_s5 + $0x18] sm:$0xff]   ;;  %v634_v40 = vld [vmem:[%s812_s5 + $0x20] sm:$0xff]  }
  0x1f   :  { %v635_v41 = vld [vmem:[%s812_s5 + $0x28] sm:$0xff]   ;;  %v59_v45 = vld [vmem:[%s809_s2] sm:$0x3]  ;;  %v636_v59 = vld [vmem:[%s812_s5 + $0x30] sm:$0xff]  }
  0x20   :  { %158 = vmatpush1.bf16.msra.mxu0 %v601_v8  ;;  %538 = vmatpush3.bf16.msra.mxu1 %v619_v18  ;;  %v64_v47 = vrot.slane %v59_v45, %v63_v44  ;;  %v68_v48 = vrot.slane %v59_v45, %v67_v46  ;;  %v637_v60 = vld [vmem:[%s812_s5 + $0x38] sm:$0xff]   ;;  %v507_v62 = vld [vmem:[%s811_s4] ss:$0 sm:$0xff] }
  0x21   :  { %159 = vmatprep.subr.bf16.mxu0 %v602_v9  ;;  %539 = vmatprep.subr.bf16.mxu1 %v620_v19  ;;  %v524_v6 = vld [vmem:[%s813_s6] ss:$0 sm:$0xff] }
  0x24   :  { %160 = vmatpush1.bf16.msra.mxu0 %v604_v12  ;;  %540 = vmatpush3.bf16.msra.mxu1 %v621_v23 }
  0x25   :  { %161 = vmatprep.subr.bf16.mxu0 %v605_v16  ;;  %541 = vmatprep.subr.bf16.mxu1 %v622_v24 }
  0x28   :  { %162 = vmatpush1.bf16.msra.mxu0 %v607_v17  ;;  %542 = vmatpush3.bf16.msra.mxu1 %v623_v25 }
  0x29   :  { %163 = vmatprep.subr.bf16.mxu0 %v608_v20  ;;  %543 = vmatprep.subr.bf16.mxu1 %v624_v28 }
  0x2c   :  { %164 = vmatpush1.bf16.msra.mxu0 %v610_v21  ;;  %544 = vmatpush3.bf16.msra.mxu1 %v625_v29 }
  0x2d   :  { %165 = vmatprep.subr.bf16.mxu0 %v611_v22  ;;  %545 = vmatprep.subr.bf16.mxu1 %v626_v31 }
  0x30   :  { %166 = vmatpush1.bf16.msra.mxu0 %v613_v26  ;;  %546 = vmatpush3.bf16.msra.mxu1 %v627_v32 }
  0x31   :  { %547 = vmatprep.subr.bf16.mxu1 %v628_v33  ;;  %564 = vmatprep.subr.bf16.mxu0 %v666_v36 }
  0x33   :  { %184 = vmatmul.mubr.bf16.vlgmr.msra.gmra.mrb[0].mxu0 %v42_v30 }
  0x34   :  { %548 = vmatpush3.bf16.msra.mxu1 %v629_v34  ;;  %565 = vmatpush3.bf16.msra.mxu0 %v630_v35 }
  0x35   :  { %566 = vmatprep.subr.bf16.mxu0 %v666_v36  ;;  %580 = vmatprep.mubr.msk.bf16.mxu0 %vm667_vm0, %v666_v36 }
  0x38   :  { %567 = vmatpush3.bf16.msra.mxu0 %v631_v37 }
  0x39   :  { %568 = vmatprep.subr.bf16.mxu0 %v666_v36 }
  0x3c   :  { %569 = vmatpush3.bf16.msra.mxu0 %v632_v38 }
  0x3d   :  { %570 = vmatprep.subr.bf16.mxu0 %v666_v36 }
  0x40   :  { %571 = vmatpush3.bf16.msra.mxu0 %v633_v39 }
  0x41   :  { %572 = vmatprep.subr.bf16.mxu0 %v666_v36 }
  0x44   :  { %573 = vmatpush3.bf16.msra.mxu0 %v634_v40 }
  0x45   :  { %574 = vmatprep.subr.bf16.mxu0 %v666_v36 }
  0x48   :  { %575 = vmatpush3.bf16.msra.mxu0 %v635_v41 }
  0x49   :  { %576 = vmatprep.subr.bf16.mxu0 %v666_v36 }
  0x4c   :  { %577 = vmatpush3.bf16.msra.mxu0 %v636_v59 }
  0x4d   :  { %578 = vmatprep.subr.bf16.mxu0 %v666_v36 }
  0x50   :  { %579 = vmatpush3.bf16.msra.mxu0 %v637_v60 }
 0x106   :  { %v185_v49 = vpop.f32.mrb[0].mxu0 }
 0x107   :  { %v186_v50 = vadd.f32 %v185_v49, %v64_v47  ;;  %v187_v51 = vpop.f32.mrb[1].mxu0 }
 0x108   :  { %v188_v52 = vadd.f32 %v187_v51, %v68_v48  ;;  %v189_v53 = vpop.f32.mrb[2].mxu0 }
 0x109   :  { %v192_v54 = vmax.f32 %v186_v50, 0.0  ;;  %v190_v55 = vpop.f32.mrb[3].mxu0 }
 0x10a   :  { %v193_v56 = vmax.f32 %v188_v52, 0.0 }
 0x10b   :  { %v194_v58 = vpack.c.bf16 %v192_v54, %v192_v54 }
 0x10c   :  { %v195_v57 = vpack.c.bf16 %v193_v56, %v193_v56 }
 0x10e   :  { %363 = vmatprep.mubr.bf16.mxu1 %v195_v57 }
 0x10f   :  { %364 = vmatmul.mubr.bf16.vlgmr.msra.gmra.mrb[0].mxu1 %v194_v58 }
 0x1e2   :  { %v549_v61 = vpop.f32.mrb[0].mxu1 }
 0x1e3   :  { %v550_v63 = vpop.f32.mrb[1].mxu1 }
 0x1e4   :  { %v551_v0 = vadd.f32 %v550_v63, %v549_v61  ;;  %v552_v1 = vpop.f32.mrb[2].mxu1 }
 0x1e5   :  { %v553_v2 = vpop.f32.mrb[3].mxu1 }
 0x1e6   :  { %v366_v3 = vadd.f32 %v551_v0, %v507_v62 }
 0x1e8   :  { %v371_v4 = vmax.f32 %v366_v3, 0.0 }
 0x1ea   :  { %v372_v5 = vpack.c.bf16 %v371_v4, %v371_v4 }
 0x1ec   :  { %581 = vmatmul.mubr.bf16.vlgmr.msra.gmra.mrb[4].mxu0 %v372_v5 }
 0x2bf   :  { %v478_v7 = vpop.f32.mrb[4].mxu0 }
 0x2c0   :  { %v479_v8 = vadd.f32 %v524_v6, %v478_v7  ;;  %v582_v9 = vpop.f32.mrb[5].mxu0 }
 0x2c1   :  { %v481_v10 = vpop.f32.mrb[6].mxu0 }
 0x2c2   :  { %485 = vst.msk [vmem:[%s814_s7] sm:$0xff] %vm484_vm1, %v479_v8  ;;  %v583_v11 = vpop.f32.mrb[7].mxu0 }
 0x2c3   :  { %490 = vsyncpa [#allocation3], 1 }

</bundles_post_ra>
